<compile_context>
chip_gen: v6e
topology: v6e:2x2x1
jax: 0.10.0
libtpu: 0.0.40
codegen_flags: <defaults>
</compile_context>

<pallas_src>
import functools

import jax
import jax.numpy as jnp
from jax.experimental import pallas as pl
from jax.experimental.pallas import tpu as pltpu


def _round_up(x, m):
    return (x + m - 1) // m * m


def _cdiv(a, b):
    return (a + b - 1) // b


def _vmem_caps():
    """Returns (physical_vmem_bytes, working_set_budget_bytes)."""
    cap = 64 * 1024 * 1024  # conservative fallback = v7x physical VMEM
    try:
        cap = int(pltpu.get_tpu_info().vmem_capacity_bytes)
    except Exception:
        pass
    # ~70% of physical VMEM for our tiles; cap so 128 MiB parts keep headroom.
    budget = min(int(cap * 0.7), 96 * 1024 * 1024)
    return cap, budget


def _logreg_kernel(x_ref, w_ref, b_ref, out_ref, acc_ref, *, approx_reciprocal):
    k = pl.program_id(1)

    @pl.when(k == 0)
    def _():
        acc_ref[...] = jnp.zeros_like(acc_ref)

    # MXU matmul chunk with f32 accumulation.
    acc_ref[...] += jnp.dot(x_ref[...], w_ref[...],
                            preferred_element_type=jnp.float32)

    @pl.when(k == pl.num_programs(1) - 1)
    def _():
        logits = acc_ref[...] + b_ref[...]            # (T, Cp) + (1, Cp)
        m = jnp.max(logits, axis=1, keepdims=True)    # numerically stable softmax
        e = jnp.exp(logits - m)
        denom = jnp.sum(e, axis=1, keepdims=True)     # >= 1 (max-subtracted)
        if approx_reciprocal:
            probs = e * pl.reciprocal(denom, approx=True)   # EUP fast path (~1e-4)
        else:
            probs = e / denom                                # exact normalization
        out_ref[...] = probs.astype(out_ref.dtype)


def logistic_regression_forward(x, w, b, *, tile_n=1024, use_bf16=False,
                                approx_reciprocal=False):
    """x: [N, F], w: [F, C], b: [C] -> softmax(x @ w + b, axis=1) as float32.

    use_bf16 halves X/W HBM traffic (recommended on v6e/v7x when tolerances
    allow).  approx_reciprocal uses the approximate EUP reciprocal in the
    softmax epilogue (rows then sum to 1 only to ~1e-4).
    """
    N, F = x.shape
    F_w, C = w.shape
    assert F == F_w, "weight/input feature mismatch"

    in_dtype = jnp.bfloat16 if use_bf16 else jnp.float32
    in_itemsize = jnp.dtype(in_dtype).itemsize

    # Lane-dense class dimension: full vst stores, fully used MXU result tiles.
    C_pad = _round_up(C, 128)

    cap, budget = _vmem_caps()

    # ---- K (feature) tiling: keep the streamed W block under ~1/3 of budget.
    max_k = (budget // 3) // (2 * C_pad * in_itemsize)
    max_k = max(128, max_k // 128 * 128)
    if F <= max_k:
        tile_k, F_pad = F, F          # single K step, W stays resident
    else:
        tile_k = min(max_k, 2048)
        F_pad = _round_up(F, tile_k)
    grid_k = F_pad // tile_k

    # ---- Row tiling from the remaining budget.
    resident = 2 * tile_k * C_pad * in_itemsize + 2 * C_pad * 4   # W bufs + bias
    per_row = 2 * tile_k * in_itemsize + 3 * C_pad * 4            # X(x2)+out(x2)+acc
    avail = max(budget - resident, per_row * 8)
    max_rows = max(8, (avail // per_row) // 8 * 8)
    tile_n = min(tile_n, max_rows)
    if N > 8:
        # Keep >= 2 row tiles so both v7x TensorCores get work.
        tile_n = min(tile_n, max(8, _round_up(_cdiv(N, 2), 8)))
    tile_n = min(tile_n, _round_up(N, 8))
    tile_n = max(8, tile_n // 8 * 8)

    N_pad = N if N % tile_n == 0 else _round_up(N, tile_n)
    grid_n = N_pad // tile_n

    # ---- Operand prep (skip copies/casts when nothing is needed).
    x_p = x if x.dtype == in_dtype else x.astype(in_dtype)
    if N_pad != N or F_pad != F:
        x_p = jnp.zeros((N_pad, F_pad), in_dtype).at[:N, :F].set(x_p)

    w_p = w if w.dtype == in_dtype else w.astype(in_dtype)
    if F_pad != F or C_pad != C:
        w_p = jnp.zeros((F_pad, C_pad), in_dtype).at[:F, :C].set(w_p)

    # Padded classes get a hugely negative bias -> exactly zero probability.
    b_p = (jnp.full((1, C_pad), jnp.float32(-1e30), jnp.float32)
           .at[0, :C].set(b.astype(jnp.float32)))

    working_set = resident + tile_n * per_row
    vmem_limit = int(min(cap, max(working_set + (8 << 20), 32 << 20)))

    cost = pl.CostEstimate(
        flops=2 * N_pad * F_pad * C_pad,
        transcendentals=N_pad * C_pad,
        bytes_accessed=(N_pad * F_pad * in_itemsize             # X
                        + grid_n * F_pad * C_pad * in_itemsize  # W per row tile
                        + C_pad * 4                             # bias
                        + N_pad * C_pad * 4),                   # output
    )

    kernel = functools.partial(_logreg_kernel,
                               approx_reciprocal=approx_reciprocal)

    def _call(single_buffer_resident):
        resident_kwargs = (
            dict(pipeline_mode=pl.Buffered(1)) if single_buffer_resident else {}
        )
        w_kwargs = resident_kwargs if grid_k == 1 else {}
        in_specs = [
            pl.BlockSpec((tile_n, tile_k), lambda i, k: (i, k)),              # X tile
            pl.BlockSpec((tile_k, C_pad), lambda i, k: (k, 0), **w_kwargs),   # W chunk
            pl.BlockSpec((1, C_pad), lambda i, k: (0, 0), **resident_kwargs), # bias
        ]
        out_spec = pl.BlockSpec((tile_n, C_pad), lambda i, k: (i, 0))
        return pl.pallas_call(
            kernel,
            out_shape=jax.ShapeDtypeStruct((N_pad, C_pad), jnp.float32),
            grid_spec=pltpu.PrefetchScalarGridSpec(
                num_scalar_prefetch=0,
                grid=(grid_n, grid_k),
                in_specs=in_specs,
                out_specs=out_spec,
                scratch_shapes=[pltpu.VMEM((tile_n, C_pad), jnp.float32)],
            ),
            compiler_params=pltpu.CompilerParams(
                dimension_semantics=("parallel", "arbitrary"),
                vmem_limit_bytes=vmem_limit,
            ),
            cost_estimate=cost,
        )(x_p, w_p, b_p)

    try:
        out = _call(True)     # single-buffer the grid-invariant W / bias blocks
    except Exception:
        out = _call(False)    # graceful fallback to default double buffering

    if N_pad != N or C_pad != C:
        out = out[:N, :C]
    return out


def logistic_regression_ref(x, w, b):
    return jax.nn.softmax(x @ w + b, axis=1)


if __name__ == "__main__":
    key = jax.random.PRNGKey(0)
    k_x, k_w, k_b = jax.random.split(key, 3)

    N, in_features, out_features = 32, 32, 16   # small shapes, matches the module
    x = jax.random.normal(k_x, (N, in_features), dtype=jnp.float32)
    # deterministic parameter init (mirrors torch.randn shapes in __init__)
    w = jax.random.normal(k_w, (in_features, out_features), dtype=jnp.float32)
    b = jax.random.normal(k_b, (out_features,), dtype=jnp.float32)

    ref = logistic_regression_ref(x, w, b)

    # 1) Default path: f32 inputs, exact softmax normalization.
    probs = jax.block_until_ready(logistic_regression_forward(x, w, b))
    assert probs.shape == (N, out_features)
    assert jnp.allclose(probs, ref, atol=1e-3, rtol=1e-3)
    assert jnp.allclose(jnp.sum(probs, axis=1), jnp.ones((N,)), atol=1e-5)

    # 2) Multi row-tile grid path (exercises pipelining / accumulator epilogue).
    probs_tiled = jax.block_until_ready(
        logistic_regression_forward(x, w, b, tile_n=8))
    assert jnp.allclose(probs_tiled, ref, atol=1e-3, rtol=1e-3)

    # 3) bf16-input path (HBM-byte saver on v6e/v7x); looser bf16 tolerance.
    probs_bf16 = jax.block_until_ready(
        logistic_regression_forward(x, w, b, use_bf16=True))
    assert jnp.allclose(probs_bf16, ref, atol=3e-2, rtol=3e-2)

    # 4) Approximate-reciprocal inference fast path (rows sum to 1 to ~1e-4).
    probs_approx = jax.block_until_ready(
        logistic_regression_forward(x, w, b, approx_reciprocal=True))
    assert jnp.allclose(probs_approx, ref, atol=1e-2, rtol=1e-2)

    print("KERNEL_OK")
</pallas_src>

<mosaic_0001>
module attributes {stable_mosaic.version = 11 : i64} {
  func.func @_logreg_kernel(%arg0: i32, %arg1: i32, %arg2: memref<16x32xf32, #tpu.memory_space<vmem>>, %arg3: memref<32x128xf32, #tpu.memory_space<vmem>>, %arg4: memref<1x128xf32, #tpu.memory_space<vmem>>, %arg5: memref<16x128xf32, #tpu.memory_space<vmem>>, %arg6: memref<16x128xf32, #tpu.memory_space<vmem>>) attributes {dimension_semantics = [#tpu.dimension_semantics<parallel>, #tpu.dimension_semantics<arbitrary>], iteration_bounds = array<i64: 2, 1>, scalar_prefetch = 0 : i64, scratch_operands = 1 : i64, tpu.core_type = #tpu.core_type<tc>, window_params = [{transform_indices = @transform_0, window_bounds = array<i64: 16, 32>}, {pipeline_mode = #tpu.pipeline_mode<synchronous>, transform_indices = @transform_1, window_bounds = array<i64: 32, 128>}, {pipeline_mode = #tpu.pipeline_mode<synchronous>, transform_indices = @transform_2, window_bounds = array<i64: 1, 128>}, {transform_indices = @transform_3, window_bounds = array<i64: 16, 128>}]} {
    %c0_i32 = arith.constant 0 : i32
    %0 = arith.cmpi eq, %arg1, %c0_i32 : i32
    %1 = arith.extui %0 : i1 to i32
    %c0_i32_0 = arith.constant 0 : i32
    %2 = arith.cmpi ne, %1, %c0_i32_0 : i32
    scf.if %2 {
      %cst_10 = arith.constant 0.000000e+00 : f32
      %12 = vector.broadcast %cst_10 : f32 to vector<16x128xf32>
      %c0_11 = arith.constant 0 : index
      %c0_12 = arith.constant 0 : index
      %13 = vector.load %arg6[%c0_11, %c0_12] : memref<16x128xf32, #tpu.memory_space<vmem>>, vector<16x128xf32>
      tpu.vector_store %arg6[%c0_11, %c0_12], %12 {strides = array<i32>} : memref<16x128xf32, #tpu.memory_space<vmem>>, vector<16x128xf32>,
    } else {
    }
    %c0 = arith.constant 0 : index
    %c0_1 = arith.constant 0 : index
    %3 = vector.load %arg6[%c0, %c0_1] : memref<16x128xf32, #tpu.memory_space<vmem>>, vector<16x128xf32>
    %c0_2 = arith.constant 0 : index
    %c0_3 = arith.constant 0 : index
    %4 = vector.load %arg2[%c0_2, %c0_3] : memref<16x32xf32, #tpu.memory_space<vmem>>, vector<16x32xf32>
    %c0_4 = arith.constant 0 : index
    %c0_5 = arith.constant 0 : index
    %5 = vector.load %arg3[%c0_4, %c0_5] : memref<32x128xf32, #tpu.memory_space<vmem>>, vector<32x128xf32>
    %cst = arith.constant dense<0.000000e+00> : vector<16x128xf32>
    %6 = tpu.matmul %4, %5, %cst {dimension_numbers = #tpu.dot_dimension_numbers<[1], [0], [0], [1], [0, 0, 1, 1], [], []>} : vector<16x32xf32>, vector<32x128xf32>, vector<16x128xf32> -> vector<16x128xf32>
    %7 = arith.addf %3, %6 : vector<16x128xf32>
    %c0_6 = arith.constant 0 : index
    %c0_7 = arith.constant 0 : index
    %8 = vector.load %arg6[%c0_6, %c0_7] : memref<16x128xf32, #tpu.memory_space<vmem>>, vector<16x128xf32>
    tpu.vector_store %arg6[%c0_6, %c0_7], %7 {strides = array<i32>} : memref<16x128xf32, #tpu.memory_space<vmem>>, vector<16x128xf32>,
    %c0_i32_8 = arith.constant 0 : i32
    %9 = arith.cmpi eq, %arg1, %c0_i32_8 : i32
    %10 = arith.extui %9 : i1 to i32
    %c0_i32_9 = arith.constant 0 : i32
    %11 = arith.cmpi ne, %10, %c0_i32_9 : i32
    scf.if %11 {
      %c0_10 = arith.constant 0 : index
      %c0_11 = arith.constant 0 : index
      %12 = vector.load %arg6[%c0_10, %c0_11] : memref<16x128xf32, #tpu.memory_space<vmem>>, vector<16x128xf32>
      %c0_12 = arith.constant 0 : index
      %c0_13 = arith.constant 0 : index
      %13 = vector.load %arg4[%c0_12, %c0_13] : memref<1x128xf32, #tpu.memory_space<vmem>>, vector<1x128xf32>
      %14 = vector.broadcast %13 : vector<1x128xf32> to vector<16x128xf32>
      %15 = arith.addf %12, %14 : vector<16x128xf32>
      %cst_14 = arith.constant dense<0xFF800000> : vector<16xf32>
      %16 = vector.multi_reduction <maximumf>, %15, %cst_14 [1] : vector<16x128xf32> to vector<16xf32>
      %17 = vector.shape_cast %16 : vector<16xf32> to vector<16x1xf32>
      %18 = vector.broadcast %17 : vector<16x1xf32> to vector<16x128xf32>
      %19 = arith.subf %15, %18 : vector<16x128xf32>
      %20 = math.exp %19 : vector<16x128xf32>
      %cst_15 = arith.constant dense<0.000000e+00> : vector<16xf32>
      %21 = vector.multi_reduction <add>, %20, %cst_15 [1] : vector<16x128xf32> to vector<16xf32>
      %22 = vector.shape_cast %21 : vector<16xf32> to vector<16x1xf32>
      %23 = vector.broadcast %22 : vector<16x1xf32> to vector<16x128xf32>
      %24 = arith.divf %20, %23 : vector<16x128xf32>
      %c0_16 = arith.constant 0 : index
      %c0_17 = arith.constant 0 : index
      %25 = vector.load %arg5[%c0_16, %c0_17] : memref<16x128xf32, #tpu.memory_space<vmem>>, vector<16x128xf32>
      tpu.vector_store %arg5[%c0_16, %c0_17], %24 {strides = array<i32>} : memref<16x128xf32, #tpu.memory_space<vmem>>, vector<16x128xf32>,
    } else {
    }
    return
  }
  func.func @transform_0(%arg0: i32, %arg1: i32) -> (i32, i32) {
    %c0_i32 = arith.constant 0 : i32
    return %arg0, %arg1 : i32, i32
  }
  func.func @transform_1(%arg0: i32, %arg1: i32) -> (i32, i32) {
    %c0_i32 = arith.constant 0 : i32
    %c0_i32_0 = arith.constant 0 : i32
    return %arg1, %c0_i32 : i32, i32
  }
  func.func @transform_2(%arg0: i32, %arg1: i32) -> (i32, i32) {
    %c0_i32 = arith.constant 0 : i32
    %c0_i32_0 = arith.constant 0 : i32
    %c0_i32_1 = arith.constant 0 : i32
    return %c0_i32, %c0_i32_0 : i32, i32
  }
  func.func @transform_3(%arg0: i32, %arg1: i32) -> (i32, i32) {
    %c0_i32 = arith.constant 0 : i32
    %c0_i32_0 = arith.constant 0 : i32
    return %arg0, %c0_i32 : i32, i32
  }
}

module attributes {stable_mosaic.version = 11 : i64} {
  func.func @_logreg_kernel(%arg0: i32, %arg1: i32, %arg2: memref<16x32xf32, #tpu.memory_space<vmem>>, %arg3: memref<32x128xf32, #tpu.memory_space<vmem>>, %arg4: memref<1x128xf32, #tpu.memory_space<vmem>>, %arg5: memref<16x128xf32, #tpu.memory_space<vmem>>, %arg6: memref<16x128xf32, #tpu.memory_space<vmem>>) attributes {dimension_semantics = [#tpu.dimension_semantics<parallel>, #tpu.dimension_semantics<arbitrary>], iteration_bounds = array<i64: 2, 1>, scalar_prefetch = 0 : i64, scratch_operands = 1 : i64, tpu.core_type = #tpu.core_type<tc>, window_params = [{transform_indices = @transform_0, window_bounds = array<i64: 16, 32>}, {transform_indices = @transform_1, window_bounds = array<i64: 32, 128>}, {pipeline_mode = #tpu.pipeline_mode<synchronous>, transform_indices = @transform_2, window_bounds = array<i64: 1, 128>}, {transform_indices = @transform_3, window_bounds = array<i64: 16, 128>}]} {
    %c0_i32 = arith.constant 0 : i32
    %0 = arith.cmpi eq, %arg1, %c0_i32 : i32
    %1 = arith.extui %0 : i1 to i32
    %c0_i32_0 = arith.constant 0 : i32
    %2 = arith.cmpi ne, %1, %c0_i32_0 : i32
    scf.if %2 {
      %cst_10 = arith.constant 0.000000e+00 : f32
      %12 = vector.broadcast %cst_10 : f32 to vector<16x128xf32>
      %c0_11 = arith.constant 0 : index
      %c0_12 = arith.constant 0 : index
      %13 = vector.load %arg6[%c0_11, %c0_12] : memref<16x128xf32, #tpu.memory_space<vmem>>, vector<16x128xf32>
      tpu.vector_store %arg6[%c0_11, %c0_12], %12 {strides = array<i32>} : memref<16x128xf32, #tpu.memory_space<vmem>>, vector<16x128xf32>,
    } else {
    }
    %c0 = arith.constant 0 : index
    %c0_1 = arith.constant 0 : index
    %3 = vector.load %arg6[%c0, %c0_1] : memref<16x128xf32, #tpu.memory_space<vmem>>, vector<16x128xf32>
    %c0_2 = arith.constant 0 : index
    %c0_3 = arith.constant 0 : index
    %4 = vector.load %arg2[%c0_2, %c0_3] : memref<16x32xf32, #tpu.memory_space<vmem>>, vector<16x32xf32>
    %c0_4 = arith.constant 0 : index
    %c0_5 = arith.constant 0 : index
    %5 = vector.load %arg3[%c0_4, %c0_5] : memref<32x128xf32, #tpu.memory_space<vmem>>, vector<32x128xf32>
    %cst = arith.constant dense<0.000000e+00> : vector<16x128xf32>
    %6 = tpu.matmul %4, %5, %cst {dimension_numbers = #tpu.dot_dimension_numbers<[1], [0], [0], [1], [0, 0, 1, 1], [], []>} : vector<16x32xf32>, vector<32x128xf32>, vector<16x128xf32> -> vector<16x128xf32>
    %7 = arith.addf %3, %6 : vector<16x128xf32>
    %c0_6 = arith.constant 0 : index
    %c0_7 = arith.constant 0 : index
    %8 = vector.load %arg6[%c0_6, %c0_7] : memref<16x128xf32, #tpu.memory_space<vmem>>, vector<16x128xf32>
    tpu.vector_store %arg6[%c0_6, %c0_7], %7 {strides = array<i32>} : memref<16x128xf32, #tpu.memory_space<vmem>>, vector<16x128xf32>,
    %c0_i32_8 = arith.constant 0 : i32
    %9 = arith.cmpi eq, %arg1, %c0_i32_8 : i32
    %10 = arith.extui %9 : i1 to i32
    %c0_i32_9 = arith.constant 0 : i32
    %11 = arith.cmpi ne, %10, %c0_i32_9 : i32
    scf.if %11 {
      %c0_10 = arith.constant 0 : index
      %c0_11 = arith.constant 0 : index
      %12 = vector.load %arg6[%c0_10, %c0_11] : memref<16x128xf32, #tpu.memory_space<vmem>>, vector<16x128xf32>
      %c0_12 = arith.constant 0 : index
      %c0_13 = arith.constant 0 : index
      %13 = vector.load %arg4[%c0_12, %c0_13] : memref<1x128xf32, #tpu.memory_space<vmem>>, vector<1x128xf32>
      %14 = vector.broadcast %13 : vector<1x128xf32> to vector<16x128xf32>
      %15 = arith.addf %12, %14 : vector<16x128xf32>
      %cst_14 = arith.constant dense<0xFF800000> : vector<16xf32>
      %16 = vector.multi_reduction <maximumf>, %15, %cst_14 [1] : vector<16x128xf32> to vector<16xf32>
      %17 = vector.shape_cast %16 : vector<16xf32> to vector<16x1xf32>
      %18 = vector.broadcast %17 : vector<16x1xf32> to vector<16x128xf32>
      %19 = arith.subf %15, %18 : vector<16x128xf32>
      %20 = math.exp %19 : vector<16x128xf32>
      %cst_15 = arith.constant dense<0.000000e+00> : vector<16xf32>
      %21 = vector.multi_reduction <add>, %20, %cst_15 [1] : vector<16x128xf32> to vector<16xf32>
      %22 = vector.shape_cast %21 : vector<16xf32> to vector<16x1xf32>
      %23 = vector.broadcast %22 : vector<16x1xf32> to vector<16x128xf32>
      %24 = arith.divf %20, %23 : vector<16x128xf32>
      %c0_16 = arith.constant 0 : index
      %c0_17 = arith.constant 0 : index
      %25 = vector.load %arg5[%c0_16, %c0_17] : memref<16x128xf32, #tpu.memory_space<vmem>>, vector<16x128xf32>
      tpu.vector_store %arg5[%c0_16, %c0_17], %24 {strides = array<i32>} : memref<16x128xf32, #tpu.memory_space<vmem>>, vector<16x128xf32>,
    } else {
    }
    return
  }
  func.func @transform_0(%arg0: i32, %arg1: i32) -> (i32, i32) {
    %c0_i32 = arith.constant 0 : i32
    return %arg0, %arg1 : i32, i32
  }
  func.func @transform_1(%arg0: i32, %arg1: i32) -> (i32, i32) {
    %c0_i32 = arith.constant 0 : i32
    %c0_i32_0 = arith.constant 0 : i32
    return %arg1, %c0_i32 : i32, i32
  }
  func.func @transform_2(%arg0: i32, %arg1: i32) -> (i32, i32) {
    %c0_i32 = arith.constant 0 : i32
    %c0_i32_0 = arith.constant 0 : i32
    %c0_i32_1 = arith.constant 0 : i32
    return %c0_i32, %c0_i32_0 : i32, i32
  }
  func.func @transform_3(%arg0: i32, %arg1: i32) -> (i32, i32) {
    %c0_i32 = arith.constant 0 : i32
    %c0_i32_0 = arith.constant 0 : i32
    return %arg0, %c0_i32 : i32, i32
  }
}

</mosaic_0001>

<bundles_post_ra>
// kernel: tpu_custom_call.1
= control target key start
LH: loop header
LB: loop body
LE: loop exit
PB: predicated region body
PF: predicated region fallthrough
CT: control target
= control target key end

     0   :  { %8 = vsyncpa [#allocation4], 0  ;;  %s960_s0 = inlined_call_operand.hbm [shape: f32[32,32], index: 0, kind: input, shape index: {}]   ;;  %s961_s1 = inlined_call_operand.hbm [shape: f32[32,128], index: 1, kind: input, shape index: {}]   ;;  %s962_s2 = inlined_call_operand.vmem [shape: f32[1,128], index: 2, kind: input, shape index: {}]   ;;  %s963_s3 = inlined_call_operand.hbm [shape: f32[32,128], index: 3, kind: output, shape index: {}]  }
   0x1   :  { %10 = vsyncpa [#allocation4 + $0x1], 0 }
   0x2   :  { %11 = vsyncpa [#allocation7], 0 }
   0x3   :  { %12 = vsyncpa [#allocation5], 0 }
   0x4   :  { %14 = vsyncpa [#allocation5 + $0x1], 0  ;;  %s764_s12 = smov 0   ;;  %s766_s13 = smov 0  }
   0x5   :  { %s768_s14 = smov 0   ;;  %s770_s15 = smov 0  }
   0x6   :  { %s772_s16 = smov 0   ;;  %s774_s17 = smov 0  }
   0x7 LB: > { %s473_s18 = sadd.s32 4294967295, %s735_s17   ;;  %s474_s19 = sadd.s32 4294967294, %s735_s17   ;;  %s735_s17 = sphi %s774_s17, %s20_s17   ;;  %s731_s16 = sphi %s772_s16, %s985_s16   ;;  %s727_s15 = sphi %s770_s15, %s984_s15   ;;  %s723_s14 = sphi %s768_s14, %s983_s14   ;;  %s719_s13 = sphi %s766_s13, %s982_s13   ;;  %s715_s12 = sphi %s764_s12, %s981_s12  }
   0x8   : > { %p54_p0 = scmp.ne.s32.totalorder %s719_s13, %s715_s12  ;;  %p798_p1 = scmp.eq.s32.totalorder %s473_s18, 0 }
   0x9   : > { %p802_p2 = scmp.eq.s32.totalorder %s473_s18, 1  ;;  %p131_p3 = scmp.eq.s32.totalorder %s474_s19, 1 }
   0xa   : > { %p808_p4 = por %p798_p1, %p54_p0  ;;  %p475_p5 = scmp.ge.s32.totalorder %s735_s17, 1 }
   0xb   : > { %p813_p6 = por %p131_p3, %p54_p0  ;;  %p138_p7 = scmp.lt.s32.totalorder %s735_s17, 3 }
   0xc   : > { %s969_s22 = scalar_select %p808_p4, 1, 0 }
   0xd   : > { %s970_s23 = scalar_select %p813_p6, 1, 0 }
   0xe   : > { %p818_p8 = pnand %p475_p5, %p138_p7  ;;  %s737_s25 = smov [#allocation6]  }
   0xf   : > { %s153_s26 = sshll.u32 %s737_s25, 4  ;;  %s32_s28 = sadd.s32 1, %s731_s16  ;;  %s154_s26 = int_to_ptr.vmem [resolvable:$true] %s153_s26 }
  0x10   : > { %p520_p9 = pneg %p818_p8  ;;  %s608_s29 = scalar_lea.vmem %s154_s26, 512 }
  0x11   : > { %p609_p13 = scmp.ne.s32.totalorder %s154_s26, %s608_s29  ;;  %p616_p5 = scmp.lt.s32.totalorder %s154_s26, %s154_s26 }
  0x12   : > { %p827_p11 = pnand %p520_p9, %p798_p1  ;;  %p617_p7 = scmp.lt.s32.totalorder %s608_s29, %s608_s29 }
  0x14   : > { %p599_p12 = pneg %p827_p11  ;;  %p618_p6 = por %p617_p7, %p616_p5 }
  0x16   : > { %p611_p0 = pnand %p609_p13, %p599_p12 }
  0x18   : > { %p612_p3 = pneg %p611_p0 }
  0x1a   : > { %p619_p4 = pnand %p618_p6, %p612_p3 }
  0x1c   : > { %622 = shalt.err (!%p619_p4)
}
  0x1d   : > { %s965_s30 = smov 128   ;;  %s966_s4 = smov 8  }
  0x1e   : > { %523 = dma.hbm_to_vmem [thread:$0]  (!%p827_p11), %s961_s1, 512, %s154_s26, [#allocation7], %s965_s30, %s965_s30, %s966_s4  }
  0x1f   : > { %p34_p4 = scmp.ge.s32.totalorder %s32_s28, 2  ;;  %s41_s7 = sadd.s32 1, %s723_s14 }
  0x20   : > { %p48_p6 = scmp.ne.s32.totalorder %s723_s14, %s719_s13  ;;  %p49_p9 = scmp.eq.s32.totalorder %s735_s17, 0 }
  0x21   : > { %s987_s28 = smov (%p34_p4, %s32_s28), 0  ;;  %p533_p0 = scmp.lt.s32.totalorder %s735_s17, 2 }
  0x22   : > { %p848_p12 = por %p49_p9, %p48_p6  ;;  %p854_p13 = por %p802_p2, %p48_p6 }
  0x23   : > { %s36_s10 = ssub.s32 %s731_s16, %s987_s28  ;;  %s170_s11 = sand.u32 1, %s723_s14  }
  0x24   : > { %p39_p11 = scmp.eq.s32.totalorder %s36_s10, 0  ;;  %s478_s18 = sshll.u32 %s170_s11, 4 }
  0x25   : > { %s493_s25 = sshll.u32 %s731_s16, 8  ;;  %s174_s5 = scalar_lea.vmem [#allocation3], %s478_s18 }
  0x26   : > { %s863_s19 = scalar_select %p39_p11, %s723_s14, %s41_s7  }
  0x27   : > { %s181_s29 = scalar_lea.hbm %s960_s0, %s493_s25  ;;  %s182_s6 = sshll.u32 %s174_s5, 4  ;;  %s183_s6 = int_to_ptr.vmem [resolvable:$true] %s182_s6 }
  0x28   : > { %p871_p2 = pnand %p533_p0, %p848_p12  ;;  %s171_s30 = scalar_lea.sflag [#allocation4], %s170_s11 }
  0x29   : > { %s636_s10 = scalar_lea.vmem %s183_s6, 256  ;;  %s740_s7 = smov [#allocation3]  }
  0x2a   : > { %p625_p3 = pneg %p871_p2  ;;  %p637_p5 = scmp.ne.s32.totalorder %s183_s6, %s636_s10 }
  0x2b   : > { %s641_s4 = sshll.u32 %s740_s7, 4  ;;  %s642_s4 = int_to_ptr.vmem [resolvable:$false] %s641_s4 }
  0x2c   : > { %p639_p7 = pnand %p637_p5, %p625_p3  ;;  %s643_s25 = scalar_lea.vmem %s642_s4, 512 }
  0x2d   : > { %p644_p6 = scmp.lt.s32.totalorder %s183_s6, %s642_s4  ;;  %p645_p9 = scmp.lt.s32.totalorder %s643_s25, %s636_s10 }
  0x2e   : > { %p640_p4 = pneg %p639_p7 }
  0x2f   : > { %p646_p11 = por %p645_p9, %p644_p6 }
  0x31   : > { %p647_p10 = pnand %p646_p11, %p640_p4 }
  0x33   : > { %650 = shalt.err (!%p647_p10)
}
  0x34   : > { %s976_s8 = smov 8   ;;  %s977_s18 = smov 128  }
  0x35   : > { %527 = dma.hbm_to_vmem [thread:$0]  (!%p871_p2), %s181_s29, 256, %s183_s6, %s171_s30, %s977_s18, %s977_s18, %s976_s8  }
  0x36   : > { %194 = sbr.rel (%p818_p8) target bundleno = 596 (0x254), region = 32  ;;  %s885_s11 = sand.u32 (!%p818_p8), 1, %s719_s13  }
  0x37   : > { %s482_s4 = sshll.u32 (!%p818_p8), %s885_s11, 4  ;;  %s197_s26 = scalar_lea.sflag (!%p818_p8), [#allocation4], %s885_s11 }
  0x38   : > { %s200_s27 = scalar_lea.vmem (!%p818_p8), [#allocation3], %s482_s4  ;;  %p978_p10 = scmp.ne.s32.totalorder (!%p818_p8), %s969_s22, 0 }
  0x3b   : > { %702 = dma.done.wait (%p978_p10), %s197_s26, 256  }
  0x3c   : > { %704 = vsyncadd (%p978_p10), %s197_s26, 4294967040 }
  0x3d   : > { %706 = dma.done.wait (%p798_p1), [#allocation7], 512  }
  0x3e   : > { %708 = vsyncadd (%p798_p1), [#allocation7], 4294966784  ;;  %vm244_vm0 = vcmask 261120   ;;  %v243_v0 = vld [vmem:[#allocation6 + $0x18] sm:$0xff]  ;;  %v242_v1 = vld [vmem:[#allocation6 + $0x10] sm:$0xff]  ;;  %s494_s24 = sshll.u32 %s727_s15, 8 }
  0x3f   : > { %501 = vmatprep.subr.mxu0 %v243_v0  ;;  %v238_v2 = vld [vmem:[%s200_s27] sm:$0xff]  ;;  %v241_v3 = vld [vmem:[#allocation6 + $0x8] sm:$0xff]  ;;  %s226_s30 = scalar_lea.vmem [#allocation8], %s482_s4  ;;  %s910_s21 = scalar_lea.hbm %s963_s3, %s494_s24 }
  0x40   : > { %502 = vmatpush3.msra.mxu0 %v243_v0  ;;  %509 = vmatprep.mubr.msk.f32.mxu0 %vm244_vm0, %v238_v2  ;;  %v240_v4 = vld [vmem:[#allocation6] sm:$0xff]  ;;  %v239_v5 = vld [vmem:[%s200_s27 + $0x8] sm:$0xff]  ;;  %s378_s29 = sshll.u32 %s226_s30, 4  ;;  %s365_s10 = scalar_lea.sflag [#allocation5], %s885_s11  ;;  %s912_s29 = int_to_ptr.vmem [resolvable:$true] %s378_s29 }
  0x41   : > { %503 = vmatprep.subr.mxu0 %v242_v1  ;;  %v487_v7 = vld [vmem:[%s962_s2] ss:$0 sm:$0xff]  ;;  %s651_s7 = scalar_lea.vmem %s912_s29, 256  ;;  %s741_s15 = smov [#allocation8]  }
  0x42   : > { %504 = vmatpush3.msra.mxu0 %v242_v1  ;;  %p652_p1 = scmp.ne.s32.totalorder %s912_s29, %s651_s7  ;;  %s655_s25 = sshll.u32 %s741_s15, 4  ;;  %s656_s25 = int_to_ptr.vmem [resolvable:$false] %s655_s25 }
  0x43   : > { %505 = vmatprep.subr.mxu0 %v241_v3  ;;  %s657_s8 = scalar_lea.vmem %s656_s25, 512  ;;  %p658_p0 = scmp.lt.s32.totalorder %s912_s29, %s656_s25 }
  0x44   : > { %506 = vmatpush3.msra.mxu0 %v241_v3  ;;  %p653_p8 = pnand %p652_p1, %p854_p13  ;;  %p659_p2 = scmp.lt.s32.totalorder %s657_s8, %s651_s7 }
  0x45   : > { %507 = vmatprep.subr.mxu0 %v240_v4 }
  0x46   : > { %508 = vmatpush3.msra.mxu0 %v240_v4  ;;  %p654_p12 = pneg %p653_p8  ;;  %p660_p3 = por %p659_p2, %p658_p0 }
  0x47   : > { %510 = vmatmul.mubr.msk.f32.vlgmr.msra.gmra.mxu0 %vm244_vm0, %v239_v5 }
  0x48   : > { %p661_p5 = pnand %p660_p3, %p654_p12 }
 0x107   : > { %v511_v6 = vpop.f32.mrf.mxu0 }
 0x108   : > { %v343_v10 = vadd.f32 %v511_v6, %v487_v7 }
 0x109   : > { %v317_v8 = vpop.f32.mrf.mxu0 }
 0x10a   : > { %v342_v9 = vadd.f32 %v487_v7, %v317_v8 }
 0x10c   : > { %344 = vmax.xlane.f32.xlu0 %v342_v9 }
 0x110   : > { %346 = vmax.xlane.f32.xlu0 %v343_v10 }
 0x195   : > { %v345_v11 = vpop.xlane.xlu0 %344 }
 0x196   : > { %v348_v12 = vsub.f32 %v342_v9, %v345_v11 }
 0x198   : > { %v350_v13 = vmul.f32 1.442695, %v348_v12 }
 0x199   : > { %v347_v14 = vpop.xlane.xlu0 %346 }
 0x19a   : > { %589 = vpow2.f32 %v350_v13  ;;  %v349_v15 = vsub.f32 %v343_v10, %v347_v14 }
 0x19c   : > { %v352_v16 = vmul.f32 1.442695, %v349_v15 }
 0x19e   : > { %591 = vpow2.f32 %v352_v16 }
 0x1a7   : > { %v590_v17 = vpop.eup %589 }
 0x1a8   : > { %354 = vadd.xlane.f32.xlu1 %v590_v17 }
 0x1ab   : > { %v592_v18 = vpop.eup %591 }
 0x1ac   : > { %356 = vadd.xlane.f32.xlu1 %v592_v18 }
 0x231   : > { %v355_v19 = vpop.xlane.xlu1 %354 }
 0x232   : > { %593 = vrcp.f32 %v355_v19 }
 0x235   : > { %v357_v20 = vpop.xlane.xlu1 %356 }
 0x236   : > { %595 = vrcp.f32 %v357_v20 }
 0x23f   : > { %v594_v21 = vpop.eup %593 }
 0x240   : > { %v359_v22 = vmul.f32 %v594_v21, %v590_v17 }
 0x242   : > { %362 = vst [vmem:[%s226_s30] sm:$0xff] %v359_v22 }
 0x243   : > { %v596_v23 = vpop.eup %595 }
 0x244   : > { %v361_v24 = vmul.f32 %v596_v23, %v592_v18 }
 0x246   : > { %363 = vst [vmem:[%s226_s30 + $0x8] sm:$0xff] %v361_v24 }
 0x247   : > { %664 = shalt.err (!%p661_p5)
}
 0x248   : > { %s665_s18 = scalar_lea.hbm %s910_s21, 256  ;;  %s669_s27 = scalar_lea.hbm %s963_s3, 512 }
 0x249   : > { %p666_p7 = scmp.ne.s32.totalorder %s910_s21, %s665_s18  ;;  %p670_p9 = scmp.lt.s32.totalorder %s910_s21, %s963_s3 }
 0x24a   : > { %p671_p11 = scmp.lt.s32.totalorder %s669_s27, %s665_s18 }
 0x24b   : > { %p667_p4 = pnand %p666_p7, %p854_p13 }
 0x24c   : > { %p672_p10 = por %p671_p11, %p670_p9 }
 0x24d   : > { %p668_p6 = pneg %p667_p4 }
 0x24f   : > { %p673_p1 = pnand %p672_p10, %p668_p6 }
 0x251   : > { %676 = shalt.err (!%p673_p1)
}
 0x252   : > { %s742_s24 = smov 128   ;;  %s743_s30 = smov 8  }
 0x253   : > { %518 = dma.vmem_to_hbm [thread:$0]  (%p854_p13), %s912_s29, 256, %s910_s21, %s365_s10, %s742_s24, %s742_s24, %s743_s30  }
 0x254 PF: > { %s393_s5 = sand.u32 1, %s715_s12   ;;  %p979_p8 = scmp.ne.s32.totalorder %s970_s23, 0 }
 0x255   : > { %p980_p12 = scmp.ge.s32.totalorder %s735_s17, 2  ;;  %s394_s6 = scalar_lea.sflag [#allocation5], %s393_s5 }
 0x257   : > { %p529_p0 = pnand %p980_p12, %p979_p8 }
 0x259   : > { %p530_p2 = pneg %p529_p0 }
 0x25b   : > { %710 = dma.done.wait (%p530_p2), %s394_s6, 256  }
 0x25c   : > { %712 = vsyncadd (%p530_p2), %s394_s6, 4294967040  ;;  %s20_s17 = sadd.s32 1, %s735_s17   ;;  %s981_s12 = smov %s719_s13 }
 0x25d   : > { %p17_p3 = scmp.ge.s32.totalorder %s20_s17, 4   ;;  %s982_s13 = smov %s723_s14 }
 0x25e   : > { %s983_s14 = smov %s863_s19  ;;  %s984_s15 = smov %s731_s16 }
 0x25f   : > { %s985_s16 = smov %s987_s28  ;;  %19 = sbr.rel (!%p17_p3) target bundleno = 7 (0x7), region = 90 }
 0x264   :  { %399 = vsyncpa [#allocation4], 1 }
 0x265   :  { %401 = vsyncpa [#allocation4 + $0x1], 1 }
 0x266   :  { %402 = vsyncpa [#allocation7], 1 }
 0x267   :  { %403 = vsyncpa [#allocation5], 1 }
 0x268   :  { %405 = vsyncpa [#allocation5 + $0x1], 1 }

// kernel: tpu_custom_call.1
= control target key start
LH: loop header
LB: loop body
LE: loop exit
PB: predicated region body
PF: predicated region fallthrough
CT: control target
= control target key end

     0   :  { %8 = vsyncpa [#allocation4], 0  ;;  %s960_s0 = inlined_call_operand.hbm [shape: f32[32,32], index: 0, kind: input, shape index: {}]   ;;  %s961_s1 = inlined_call_operand.hbm [shape: f32[32,128], index: 1, kind: input, shape index: {}]   ;;  %s962_s2 = inlined_call_operand.vmem [shape: f32[1,128], index: 2, kind: input, shape index: {}]   ;;  %s963_s3 = inlined_call_operand.hbm [shape: f32[32,128], index: 3, kind: output, shape index: {}]  }
   0x1   :  { %10 = vsyncpa [#allocation4 + $0x1], 0 }
   0x2   :  { %11 = vsyncpa [#allocation7], 0 }
   0x3   :  { %12 = vsyncpa [#allocation5], 0 }
   0x4   :  { %14 = vsyncpa [#allocation5 + $0x1], 0  ;;  %s764_s12 = smov 0   ;;  %s766_s13 = smov 0  }
   0x5   :  { %s768_s14 = smov 0   ;;  %s770_s15 = smov 0  }
   0x6   :  { %s772_s16 = smov 0   ;;  %s774_s17 = smov 0  }
   0x7 LB: > { %s473_s18 = sadd.s32 4294967295, %s735_s17   ;;  %s474_s19 = sadd.s32 4294967294, %s735_s17   ;;  %s735_s17 = sphi %s774_s17, %s20_s17   ;;  %s731_s16 = sphi %s772_s16, %s985_s16   ;;  %s727_s15 = sphi %s770_s15, %s984_s15   ;;  %s723_s14 = sphi %s768_s14, %s983_s14   ;;  %s719_s13 = sphi %s766_s13, %s982_s13   ;;  %s715_s12 = sphi %s764_s12, %s981_s12  }
   0x8   : > { %p54_p0 = scmp.ne.s32.totalorder %s719_s13, %s715_s12  ;;  %p798_p1 = scmp.eq.s32.totalorder %s473_s18, 0 }
   0x9   : > { %p802_p2 = scmp.eq.s32.totalorder %s473_s18, 1  ;;  %p131_p3 = scmp.eq.s32.totalorder %s474_s19, 1 }
   0xa   : > { %p808_p4 = por %p798_p1, %p54_p0  ;;  %p475_p5 = scmp.ge.s32.totalorder %s735_s17, 1 }
   0xb   : > { %p813_p6 = por %p131_p3, %p54_p0  ;;  %p138_p7 = scmp.lt.s32.totalorder %s735_s17, 3 }
   0xc   : > { %s969_s22 = scalar_select %p808_p4, 1, 0 }
   0xd   : > { %s970_s23 = scalar_select %p813_p6, 1, 0 }
   0xe   : > { %p818_p8 = pnand %p475_p5, %p138_p7  ;;  %s737_s25 = smov [#allocation6]  }
   0xf   : > { %s153_s26 = sshll.u32 %s737_s25, 4  ;;  %s32_s28 = sadd.s32 1, %s731_s16  ;;  %s154_s26 = int_to_ptr.vmem [resolvable:$true] %s153_s26 }
  0x10   : > { %p520_p9 = pneg %p818_p8  ;;  %s608_s29 = scalar_lea.vmem %s154_s26, 512 }
  0x11   : > { %p609_p13 = scmp.ne.s32.totalorder %s154_s26, %s608_s29  ;;  %p616_p5 = scmp.lt.s32.totalorder %s154_s26, %s154_s26 }
  0x12   : > { %p827_p11 = pnand %p520_p9, %p798_p1  ;;  %p617_p7 = scmp.lt.s32.totalorder %s608_s29, %s608_s29 }
  0x14   : > { %p599_p12 = pneg %p827_p11  ;;  %p618_p6 = por %p617_p7, %p616_p5 }
  0x16   : > { %p611_p0 = pnand %p609_p13, %p599_p12 }
  0x18   : > { %p612_p3 = pneg %p611_p0 }
  0x1a   : > { %p619_p4 = pnand %p618_p6, %p612_p3 }
  0x1c   : > { %622 = shalt.err (!%p619_p4)
}
  0x1d   : > { %s965_s30 = smov 128   ;;  %s966_s4 = smov 8  }
  0x1e   : > { %523 = dma.hbm_to_vmem [thread:$0]  (!%p827_p11), %s961_s1, 512, %s154_s26, [#allocation7], %s965_s30, %s965_s30, %s966_s4  }
  0x1f   : > { %p34_p4 = scmp.ge.s32.totalorder %s32_s28, 2  ;;  %s41_s7 = sadd.s32 1, %s723_s14 }
  0x20   : > { %p48_p6 = scmp.ne.s32.totalorder %s723_s14, %s719_s13  ;;  %p49_p9 = scmp.eq.s32.totalorder %s735_s17, 0 }
  0x21   : > { %s987_s28 = smov (%p34_p4, %s32_s28), 0  ;;  %p533_p0 = scmp.lt.s32.totalorder %s735_s17, 2 }
  0x22   : > { %p848_p12 = por %p49_p9, %p48_p6  ;;  %p854_p13 = por %p802_p2, %p48_p6 }
  0x23   : > { %s36_s10 = ssub.s32 %s731_s16, %s987_s28  ;;  %s170_s11 = sand.u32 1, %s723_s14  }
  0x24   : > { %p39_p11 = scmp.eq.s32.totalorder %s36_s10, 0  ;;  %s478_s18 = sshll.u32 %s170_s11, 4 }
  0x25   : > { %s493_s25 = sshll.u32 %s731_s16, 8  ;;  %s174_s5 = scalar_lea.vmem [#allocation3], %s478_s18 }
  0x26   : > { %s863_s19 = scalar_select %p39_p11, %s723_s14, %s41_s7  }
  0x27   : > { %s181_s29 = scalar_lea.hbm %s960_s0, %s493_s25  ;;  %s182_s6 = sshll.u32 %s174_s5, 4  ;;  %s183_s6 = int_to_ptr.vmem [resolvable:$true] %s182_s6 }
  0x28   : > { %p871_p2 = pnand %p533_p0, %p848_p12  ;;  %s171_s30 = scalar_lea.sflag [#allocation4], %s170_s11 }
  0x29   : > { %s636_s10 = scalar_lea.vmem %s183_s6, 256  ;;  %s740_s7 = smov [#allocation3]  }
  0x2a   : > { %p625_p3 = pneg %p871_p2  ;;  %p637_p5 = scmp.ne.s32.totalorder %s183_s6, %s636_s10 }
  0x2b   : > { %s641_s4 = sshll.u32 %s740_s7, 4  ;;  %s642_s4 = int_to_ptr.vmem [resolvable:$false] %s641_s4 }
  0x2c   : > { %p639_p7 = pnand %p637_p5, %p625_p3  ;;  %s643_s25 = scalar_lea.vmem %s642_s4, 512 }
  0x2d   : > { %p644_p6 = scmp.lt.s32.totalorder %s183_s6, %s642_s4  ;;  %p645_p9 = scmp.lt.s32.totalorder %s643_s25, %s636_s10 }
  0x2e   : > { %p640_p4 = pneg %p639_p7 }
  0x2f   : > { %p646_p11 = por %p645_p9, %p644_p6 }
  0x31   : > { %p647_p10 = pnand %p646_p11, %p640_p4 }
  0x33   : > { %650 = shalt.err (!%p647_p10)
}
  0x34   : > { %s976_s8 = smov 8   ;;  %s977_s18 = smov 128  }
  0x35   : > { %527 = dma.hbm_to_vmem [thread:$0]  (!%p871_p2), %s181_s29, 256, %s183_s6, %s171_s30, %s977_s18, %s977_s18, %s976_s8  }
  0x36   : > { %194 = sbr.rel (%p818_p8) target bundleno = 596 (0x254), region = 32  ;;  %s885_s11 = sand.u32 (!%p818_p8), 1, %s719_s13  }
  0x37   : > { %s482_s4 = sshll.u32 (!%p818_p8), %s885_s11, 4  ;;  %s197_s26 = scalar_lea.sflag (!%p818_p8), [#allocation4], %s885_s11 }
  0x38   : > { %s200_s27 = scalar_lea.vmem (!%p818_p8), [#allocation3], %s482_s4  ;;  %p978_p10 = scmp.ne.s32.totalorder (!%p818_p8), %s969_s22, 0 }
  0x3b   : > { %702 = dma.done.wait (%p978_p10), %s197_s26, 256  }
  0x3c   : > { %704 = vsyncadd (%p978_p10), %s197_s26, 4294967040 }
  0x3d   : > { %706 = dma.done.wait (%p798_p1), [#allocation7], 512  }
  0x3e   : > { %708 = vsyncadd (%p798_p1), [#allocation7], 4294966784  ;;  %vm244_vm0 = vcmask 261120   ;;  %v243_v0 = vld [vmem:[#allocation6 + $0x18] sm:$0xff]  ;;  %v242_v1 = vld [vmem:[#allocation6 + $0x10] sm:$0xff]  ;;  %s494_s24 = sshll.u32 %s727_s15, 8 }
  0x3f   : > { %501 = vmatprep.subr.mxu0 %v243_v0  ;;  %v238_v2 = vld [vmem:[%s200_s27] sm:$0xff]  ;;  %v241_v3 = vld [vmem:[#allocation6 + $0x8] sm:$0xff]  ;;  %s226_s30 = scalar_lea.vmem [#allocation8], %s482_s4  ;;  %s910_s21 = scalar_lea.hbm %s963_s3, %s494_s24 }
  0x40   : > { %502 = vmatpush3.msra.mxu0 %v243_v0  ;;  %509 = vmatprep.mubr.msk.f32.mxu0 %vm244_vm0, %v238_v2  ;;  %v240_v4 = vld [vmem:[#allocation6] sm:$0xff]  ;;  %v239_v5 = vld [vmem:[%s200_s27 + $0x8] sm:$0xff]  ;;  %s378_s29 = sshll.u32 %s226_s30, 4  ;;  %s365_s10 = scalar_lea.sflag [#allocation5], %s885_s11  ;;  %s912_s29 = int_to_ptr.vmem [resolvable:$true] %s378_s29 }
  0x41   : > { %503 = vmatprep.subr.mxu0 %v242_v1  ;;  %v487_v7 = vld [vmem:[%s962_s2] ss:$0 sm:$0xff]  ;;  %s651_s7 = scalar_lea.vmem %s912_s29, 256  ;;  %s741_s15 = smov [#allocation8]  }
  0x42   : > { %504 = vmatpush3.msra.mxu0 %v242_v1  ;;  %p652_p1 = scmp.ne.s32.totalorder %s912_s29, %s651_s7  ;;  %s655_s25 = sshll.u32 %s741_s15, 4  ;;  %s656_s25 = int_to_ptr.vmem [resolvable:$false] %s655_s25 }
  0x43   : > { %505 = vmatprep.subr.mxu0 %v241_v3  ;;  %s657_s8 = scalar_lea.vmem %s656_s25, 512  ;;  %p658_p0 = scmp.lt.s32.totalorder %s912_s29, %s656_s25 }
  0x44   : > { %506 = vmatpush3.msra.mxu0 %v241_v3  ;;  %p653_p8 = pnand %p652_p1, %p854_p13  ;;  %p659_p2 = scmp.lt.s32.totalorder %s657_s8, %s651_s7 }
  0x45   : > { %507 = vmatprep.subr.mxu0 %v240_v4 }
  0x46   : > { %508 = vmatpush3.msra.mxu0 %v240_v4  ;;  %p654_p12 = pneg %p653_p8  ;;  %p660_p3 = por %p659_p2, %p658_p0 }
  0x47   : > { %510 = vmatmul.mubr.msk.f32.vlgmr.msra.gmra.mxu0 %vm244_vm0, %v239_v5 }
  0x48   : > { %p661_p5 = pnand %p660_p3, %p654_p12 }
 0x107   : > { %v511_v6 = vpop.f32.mrf.mxu0 }
 0x108   : > { %v343_v10 = vadd.f32 %v511_v6, %v487_v7 }
 0x109   : > { %v317_v8 = vpop.f32.mrf.mxu0 }
 0x10a   : > { %v342_v9 = vadd.f32 %v487_v7, %v317_v8 }
 0x10c   : > { %344 = vmax.xlane.f32.xlu0 %v342_v9 }
 0x110   : > { %346 = vmax.xlane.f32.xlu0 %v343_v10 }
 0x195   : > { %v345_v11 = vpop.xlane.xlu0 %344 }
 0x196   : > { %v348_v12 = vsub.f32 %v342_v9, %v345_v11 }
 0x198   : > { %v350_v13 = vmul.f32 1.442695, %v348_v12 }
 0x199   : > { %v347_v14 = vpop.xlane.xlu0 %346 }
 0x19a   : > { %589 = vpow2.f32 %v350_v13  ;;  %v349_v15 = vsub.f32 %v343_v10, %v347_v14 }
 0x19c   : > { %v352_v16 = vmul.f32 1.442695, %v349_v15 }
 0x19e   : > { %591 = vpow2.f32 %v352_v16 }
 0x1a7   : > { %v590_v17 = vpop.eup %589 }
 0x1a8   : > { %354 = vadd.xlane.f32.xlu1 %v590_v17 }
 0x1ab   : > { %v592_v18 = vpop.eup %591 }
 0x1ac   : > { %356 = vadd.xlane.f32.xlu1 %v592_v18 }
 0x231   : > { %v355_v19 = vpop.xlane.xlu1 %354 }
 0x232   : > { %593 = vrcp.f32 %v355_v19 }
 0x235   : > { %v357_v20 = vpop.xlane.xlu1 %356 }
 0x236   : > { %595 = vrcp.f32 %v357_v20 }
 0x23f   : > { %v594_v21 = vpop.eup %593 }
 0x240   : > { %v359_v22 = vmul.f32 %v594_v21, %v590_v17 }
 0x242   : > { %362 = vst [vmem:[%s226_s30] sm:$0xff] %v359_v22 }
 0x243   : > { %v596_v23 = vpop.eup %595 }
 0x244   : > { %v361_v24 = vmul.f32 %v596_v23, %v592_v18 }
 0x246   : > { %363 = vst [vmem:[%s226_s30 + $0x8] sm:$0xff] %v361_v24 }
 0x247   : > { %664 = shalt.err (!%p661_p5)
}
 0x248   : > { %s665_s18 = scalar_lea.hbm %s910_s21, 256  ;;  %s669_s27 = scalar_lea.hbm %s963_s3, 512 }
 0x249   : > { %p666_p7 = scmp.ne.s32.totalorder %s910_s21, %s665_s18  ;;  %p670_p9 = scmp.lt.s32.totalorder %s910_s21, %s963_s3 }
 0x24a   : > { %p671_p11 = scmp.lt.s32.totalorder %s669_s27, %s665_s18 }
 0x24b   : > { %p667_p4 = pnand %p666_p7, %p854_p13 }
 0x24c   : > { %p672_p10 = por %p671_p11, %p670_p9 }
 0x24d   : > { %p668_p6 = pneg %p667_p4 }
 0x24f   : > { %p673_p1 = pnand %p672_p10, %p668_p6 }
 0x251   : > { %676 = shalt.err (!%p673_p1)
}
 0x252   : > { %s742_s24 = smov 128   ;;  %s743_s30 = smov 8  }
 0x253   : > { %518 = dma.vmem_to_hbm [thread:$0]  (%p854_p13), %s912_s29, 256, %s910_s21, %s365_s10, %s742_s24, %s742_s24, %s743_s30  }
 0x254 PF: > { %s393_s5 = sand.u32 1, %s715_s12   ;;  %p979_p8 = scmp.ne.s32.totalorder %s970_s23, 0 }
 0x255   : > { %p980_p12 = scmp.ge.s32.totalorder %s735_s17, 2  ;;  %s394_s6 = scalar_lea.sflag [#allocation5], %s393_s5 }
 0x257   : > { %p529_p0 = pnand %p980_p12, %p979_p8 }
 0x259   : > { %p530_p2 = pneg %p529_p0 }
 0x25b   : > { %710 = dma.done.wait (%p530_p2), %s394_s6, 256  }
 0x25c   : > { %712 = vsyncadd (%p530_p2), %s394_s6, 4294967040  ;;  %s20_s17 = sadd.s32 1, %s735_s17   ;;  %s981_s12 = smov %s719_s13 }
 0x25d   : > { %p17_p3 = scmp.ge.s32.totalorder %s20_s17, 4   ;;  %s982_s13 = smov %s723_s14 }
 0x25e   : > { %s983_s14 = smov %s863_s19  ;;  %s984_s15 = smov %s731_s16 }
 0x25f   : > { %s985_s16 = smov %s987_s28  ;;  %19 = sbr.rel (!%p17_p3) target bundleno = 7 (0x7), region = 90 }
 0x264   :  { %399 = vsyncpa [#allocation4], 1 }
 0x265   :  { %401 = vsyncpa [#allocation4 + $0x1], 1 }
 0x266   :  { %402 = vsyncpa [#allocation7], 1 }
 0x267   :  { %403 = vsyncpa [#allocation5], 1 }
 0x268   :  { %405 = vsyncpa [#allocation5 + $0x1], 1 }

</bundles_post_ra>
